<compile_context>
chip_gen: v6e
topology: v6e:2x2x1
jax: 0.10.0
libtpu: 0.0.40
codegen_flags: <defaults>
</compile_context>

<pallas_src>
import jax
import jax.numpy as jnp
from jax.experimental import pallas as pl
from jax.experimental.pallas import tpu as pltpu

HIDDEN = 768
NUM_LABELS = 2
MAX_BLOCK_B = 1024   # f32: 3 MiB/tile, 6 MiB double-buffered -> safe on v5e 16 MiB default


def _ssp_head_kernel(x_ref, w_ref, b_ref, o_ref):
    # TODO(synk): training-mode dropout (pltpu.prng_seed/prng_random_bits mask)
    #             is not implemented; this is the eval/inference path only.
    x = x_ref[...]                                   # [TB, H] in producer dtype
    w = w_ref[...]                                   # [H, OUT] matching x dtype
    acc = jnp.dot(x, w, preferred_element_type=jnp.float32)   # MXU, f32 accum
    o_ref[...] = (acc + b_ref[...]).astype(o_ref.dtype)       # bias is f32 [1, OUT]


def ssp_head(pooled_output, weight, bias, *, block_b=MAX_BLOCK_B):
    """SSPHead forward.

    pooled_output: [B, 768] (any float dtype; compute happens in that dtype,
                   f32 MXU accumulation).
    weight:        [2, 768] (PyTorch nn.Linear layout).
    bias:          [2].
    Returns logits [B, 2] in pooled_output's dtype.
    """
    B, H = pooled_output.shape
    assert H == HIDDEN
    assert weight.shape == (NUM_LABELS, HIDDEN)
    assert bias.shape == (NUM_LABELS,)
    out_dtype = pooled_output.dtype

    x = pooled_output
    # One-time tiny parameter transforms (6 KB; constant-folded for fixed params).
    # Do NOT cast the big activation here -- a standalone cast doubles HBM traffic.
    w_t = weight.T.astype(x.dtype)                       # [H, OUT], MXU-native RHS
    b2d = bias.reshape(1, NUM_LABELS).astype(jnp.float32)

    # Tile selection:
    #  * dtype-dependent sublane alignment (f32: 8, bf16: 16, 8-bit: 32)
    #  * aim for >= 2 grid steps so v7x's two TensorCores both get work
    #  * cap at block_b so a tile stays well inside v5e's scoped VMEM
    itemsize = jnp.dtype(x.dtype).itemsize
    sub = {4: 8, 2: 16, 1: 32}.get(itemsize, 8)
    target_tiles = max(2, pl.cdiv(B, block_b))
    tb = pl.cdiv(B, target_tiles)
    tb = ((tb + sub - 1) // sub) * sub
    tb = max(sub, min(tb, ((block_b + sub - 1) // sub) * sub))
    grid_b = pl.cdiv(B, tb)

    out_itemsize = jnp.dtype(out_dtype).itemsize
    cost = pl.CostEstimate(
        flops=2 * B * HIDDEN * NUM_LABELS,
        transcendentals=0,
        bytes_accessed=(B * HIDDEN * itemsize
                        + HIDDEN * NUM_LABELS * itemsize
                        + B * NUM_LABELS * out_itemsize),
    )

    return pl.pallas_call(
        _ssp_head_kernel,
        out_shape=jax.ShapeDtypeStruct((B, NUM_LABELS), out_dtype),
        grid_spec=pltpu.PrefetchScalarGridSpec(
            num_scalar_prefetch=0,
            grid=(grid_b,),
            in_specs=[
                # x tile marches down the batch (double-buffered); weight & bias
                # stay resident across the whole grid.
                pl.BlockSpec((tb, HIDDEN), lambda i: (i, 0)),
                pl.BlockSpec((HIDDEN, NUM_LABELS), lambda i: (0, 0)),
                pl.BlockSpec((1, NUM_LABELS), lambda i: (0, 0)),
            ],
            out_specs=pl.BlockSpec((tb, NUM_LABELS), lambda i: (i, 0)),
        ),
        compiler_params=pltpu.CompilerParams(
            dimension_semantics=("parallel",)),
        cost_estimate=cost,
    )(x, w_t, b2d)


if __name__ == "__main__":
    key = jax.random.PRNGKey(0)
    k_x, k_w, k_b, k_x2 = jax.random.split(key, 4)

    # Deterministic parameters matching nn.Linear(768, 2):
    # weight [2, 768], bias [2], uniform(-1/sqrt(768), 1/sqrt(768)).
    bound = 1.0 / (HIDDEN ** 0.5)
    weight = jax.random.uniform(k_w, (NUM_LABELS, HIDDEN),
                                minval=-bound, maxval=bound, dtype=jnp.float32)
    bias = jax.random.uniform(k_b, (NUM_LABELS,),
                              minval=-bound, maxval=bound, dtype=jnp.float32)

    # --- f32 path, batch multiple of the sublane tile ---
    B = 8
    pooled = jax.random.normal(k_x, (B, HIDDEN), dtype=jnp.float32)
    logits = ssp_head(pooled, weight, bias)
    jax.block_until_ready(logits)
    ref = pooled @ weight.T + bias
    assert logits.shape == (B, NUM_LABELS)
    assert jnp.allclose(logits, ref, atol=1e-5, rtol=1e-5)

    # --- f32 path, ragged batch (exercises Pallas partial-block masking) ---
    B2 = 5
    pooled2 = jax.random.normal(k_x2, (B2, HIDDEN), dtype=jnp.float32)
    logits2 = ssp_head(pooled2, weight, bias)
    jax.block_until_ready(logits2)
    ref2 = pooled2 @ weight.T + bias
    assert logits2.shape == (B2, NUM_LABELS)
    assert jnp.allclose(logits2, ref2, atol=1e-5, rtol=1e-5)

    # --- producer-emitted bf16 activations (weight cast matches in-wrapper) ---
    pooled_bf16 = pooled.astype(jnp.bfloat16)
    logits_bf16 = ssp_head(pooled_bf16, weight, bias)
    jax.block_until_ready(logits_bf16)
    assert logits_bf16.shape == (B, NUM_LABELS)
    assert jnp.allclose(logits_bf16.astype(jnp.float32), ref, atol=5e-2, rtol=5e-2)

    print("KERNEL_OK")
</pallas_src>

<mosaic_0001>
module attributes {stable_mosaic.version = 11 : i64} {
  func.func @_ssp_head_kernel(%arg0: i32, %arg1: memref<8x768xf32, #tpu.memory_space<vmem>>, %arg2: memref<768x2xf32, #tpu.memory_space<vmem>>, %arg3: memref<1x2xf32, #tpu.memory_space<vmem>>, %arg4: memref<8x2xf32, #tpu.memory_space<vmem>>) attributes {dimension_semantics = [#tpu.dimension_semantics<parallel>], iteration_bounds = array<i64: 1>, scalar_prefetch = 0 : i64, scratch_operands = 0 : i64, tpu.core_type = #tpu.core_type<tc>, window_params = [{transform_indices = @transform_0, window_bounds = array<i64: 8, 768>}, {pipeline_mode = #tpu.pipeline_mode<synchronous>, transform_indices = @transform_1, window_bounds = array<i64: 768, 2>}, {pipeline_mode = #tpu.pipeline_mode<synchronous>, transform_indices = @transform_2, window_bounds = array<i64: 1, 2>}, {transform_indices = @transform_3, window_bounds = array<i64: 8, 2>}]} {
    %c0 = arith.constant 0 : index
    %c0_0 = arith.constant 0 : index
    %0 = vector.load %arg1[%c0, %c0_0] : memref<8x768xf32, #tpu.memory_space<vmem>>, vector<8x768xf32>
    %c0_1 = arith.constant 0 : index
    %c0_2 = arith.constant 0 : index
    %1 = vector.load %arg2[%c0_1, %c0_2] : memref<768x2xf32, #tpu.memory_space<vmem>>, vector<768x2xf32>
    %cst = arith.constant dense<0.000000e+00> : vector<8x2xf32>
    %2 = tpu.matmul %0, %1, %cst {dimension_numbers = #tpu.dot_dimension_numbers<[1], [0], [0], [1], [0, 0, 1, 1], [], []>} : vector<8x768xf32>, vector<768x2xf32>, vector<8x2xf32> -> vector<8x2xf32>
    %c0_3 = arith.constant 0 : index
    %c0_4 = arith.constant 0 : index
    %3 = vector.load %arg3[%c0_3, %c0_4] : memref<1x2xf32, #tpu.memory_space<vmem>>, vector<1x2xf32>
    %4 = vector.broadcast %3 : vector<1x2xf32> to vector<8x2xf32>
    %5 = arith.addf %2, %4 : vector<8x2xf32>
    %c0_5 = arith.constant 0 : index
    %c0_6 = arith.constant 0 : index
    %6 = vector.load %arg4[%c0_5, %c0_6] : memref<8x2xf32, #tpu.memory_space<vmem>>, vector<8x2xf32>
    tpu.vector_store %arg4[%c0_5, %c0_6], %5 {strides = array<i32>} : memref<8x2xf32, #tpu.memory_space<vmem>>, vector<8x2xf32>,
    return
  }
  func.func @transform_0(%arg0: i32) -> (i32, i32) {
    %c0_i32 = arith.constant 0 : i32
    %c0_i32_0 = arith.constant 0 : i32
    return %arg0, %c0_i32 : i32, i32
  }
  func.func @transform_1(%arg0: i32) -> (i32, i32) {
    %c0_i32 = arith.constant 0 : i32
    %c0_i32_0 = arith.constant 0 : i32
    %c0_i32_1 = arith.constant 0 : i32
    return %c0_i32, %c0_i32_0 : i32, i32
  }
  func.func @transform_2(%arg0: i32) -> (i32, i32) {
    %c0_i32 = arith.constant 0 : i32
    %c0_i32_0 = arith.constant 0 : i32
    %c0_i32_1 = arith.constant 0 : i32
    return %c0_i32, %c0_i32_0 : i32, i32
  }
  func.func @transform_3(%arg0: i32) -> (i32, i32) {
    %c0_i32 = arith.constant 0 : i32
    %c0_i32_0 = arith.constant 0 : i32
    return %arg0, %c0_i32 : i32, i32
  }
}

</mosaic_0001>

<bundles_post_ra>
// kernel: tpu_custom_call.1
= control target key start
LH: loop header
LB: loop body
LE: loop exit
PB: predicated region body
PF: predicated region fallthrough
CT: control target
= control target key end

     0   :  { %vm333_vm0 = vcmask 15360   ;;  %s777_s1 = inlined_call_operand.vmem [shape: f32[768,2], index: 1, kind: input, shape index: {}]   ;;  %s778_s0 = inlined_call_operand.vmem [shape: f32[8,768], index: 0, kind: input, shape index: {}]   ;;  %s779_s2 = inlined_call_operand.vmem [shape: f32[1,2], index: 2, kind: input, shape index: {}]   ;;  %s780_s3 = inlined_call_operand.vmem [shape: f32[8,2], index: 3, kind: output, shape index: {}]  }
   0x1   :  { %v51_v0 = vld [vmem:[%s777_s1 + $0xf8] sm:$0xff]  ;;  %v50_v2 = vld [vmem:[%s777_s1 + $0xf0] sm:$0xff]  ;;  %v49_v6 = vld [vmem:[%s777_s1 + $0xe8] sm:$0xff] }
   0x2   :  { %v35_v1 = vld [vmem:[%s777_s1 + $0x78] sm:$0xff]  ;;  %340 = vmatprep.subr.mxu0 %v51_v0  ;;  %v34_v4 = vld [vmem:[%s777_s1 + $0x70] sm:$0xff]  ;;  %v33_v8 = vld [vmem:[%s777_s1 + $0x68] sm:$0xff] }
   0x3   :  { %v83_v3 = vld [vmem:[%s777_s1 + $0x1f8] sm:$0xff]  ;;  %341 = vmatpush3.msra.mxu0 %v35_v1  ;;  %v82_v7 = vld [vmem:[%s777_s1 + $0x1f0] sm:$0xff]  ;;  %v81_v10 = vld [vmem:[%s777_s1 + $0x1e8] sm:$0xff] }
   0x4   :  { %v67_v5 = vld [vmem:[%s777_s1 + $0x178] sm:$0xff]  ;;  %375 = vmatprep.subr.mxu1 %v83_v3  ;;  %342 = vmatprep.subr.mxu0 %v50_v2  ;;  %v66_v9 = vld [vmem:[%s777_s1 + $0x170] sm:$0xff]  ;;  %v48_v11 = vld [vmem:[%s777_s1 + $0xe0] sm:$0xff] }
   0x5   :  { %376 = vmatpush3.msra.mxu1 %v67_v5  ;;  %343 = vmatpush3.msra.mxu0 %v34_v4  ;;  %v65_v12 = vld [vmem:[%s777_s1 + $0x168] sm:$0xff]  ;;  %v32_v13 = vld [vmem:[%s777_s1 + $0x60] sm:$0xff]  ;;  %v47_v15 = vld [vmem:[%s777_s1 + $0xd8] sm:$0xff] }
   0x6   :  { %377 = vmatprep.subr.mxu1 %v82_v7  ;;  %344 = vmatprep.subr.mxu0 %v49_v6  ;;  %v80_v14 = vld [vmem:[%s777_s1 + $0x1e0] sm:$0xff]  ;;  %v31_v17 = vld [vmem:[%s777_s1 + $0x58] sm:$0xff]  ;;  %v46_v19 = vld [vmem:[%s777_s1 + $0xd0] sm:$0xff] }
   0x7   :  { %378 = vmatpush3.msra.mxu1 %v66_v9  ;;  %345 = vmatpush3.msra.mxu0 %v33_v8  ;;  %v64_v16 = vld [vmem:[%s777_s1 + $0x160] sm:$0xff]  ;;  %v79_v18 = vld [vmem:[%s777_s1 + $0x1d8] sm:$0xff]  ;;  %v30_v21 = vld [vmem:[%s777_s1 + $0x50] sm:$0xff] }
   0x8   :  { %379 = vmatprep.subr.mxu1 %v81_v10  ;;  %346 = vmatprep.subr.mxu0 %v48_v11  ;;  %v63_v20 = vld [vmem:[%s777_s1 + $0x158] sm:$0xff]  ;;  %v78_v22 = vld [vmem:[%s777_s1 + $0x1d0] sm:$0xff]  ;;  %v45_v23 = vld [vmem:[%s777_s1 + $0xc8] sm:$0xff] }
   0x9   :  { %380 = vmatpush3.msra.mxu1 %v65_v12  ;;  %347 = vmatpush3.msra.mxu0 %v32_v13  ;;  %v62_v24 = vld [vmem:[%s777_s1 + $0x150] sm:$0xff]  ;;  %v29_v25 = vld [vmem:[%s777_s1 + $0x48] sm:$0xff]  ;;  %v44_v27 = vld [vmem:[%s777_s1 + $0xc0] sm:$0xff] }
   0xa   :  { %381 = vmatprep.subr.mxu1 %v80_v14  ;;  %348 = vmatprep.subr.mxu0 %v47_v15  ;;  %v77_v26 = vld [vmem:[%s777_s1 + $0x1c8] sm:$0xff]  ;;  %v28_v29 = vld [vmem:[%s777_s1 + $0x40] sm:$0xff]  ;;  %v43_v31 = vld [vmem:[%s777_s1 + $0xb8] sm:$0xff] }
   0xb   :  { %382 = vmatpush3.msra.mxu1 %v64_v16  ;;  %349 = vmatpush3.msra.mxu0 %v31_v17  ;;  %v61_v28 = vld [vmem:[%s777_s1 + $0x148] sm:$0xff]  ;;  %v76_v30 = vld [vmem:[%s777_s1 + $0x1c0] sm:$0xff]  ;;  %v27_v33 = vld [vmem:[%s777_s1 + $0x38] sm:$0xff] }
   0xc   :  { %383 = vmatprep.subr.mxu1 %v79_v18  ;;  %350 = vmatprep.subr.mxu0 %v46_v19  ;;  %v60_v32 = vld [vmem:[%s777_s1 + $0x140] sm:$0xff]  ;;  %v75_v34 = vld [vmem:[%s777_s1 + $0x1b8] sm:$0xff]  ;;  %v42_v35 = vld [vmem:[%s777_s1 + $0xb0] sm:$0xff] }
   0xd   :  { %384 = vmatpush3.msra.mxu1 %v63_v20  ;;  %351 = vmatpush3.msra.mxu0 %v30_v21  ;;  %v59_v36 = vld [vmem:[%s777_s1 + $0x138] sm:$0xff]  ;;  %v26_v37 = vld [vmem:[%s777_s1 + $0x30] sm:$0xff]  ;;  %v41_v39 = vld [vmem:[%s777_s1 + $0xa8] sm:$0xff] }
   0xe   :  { %385 = vmatprep.subr.mxu1 %v78_v22  ;;  %352 = vmatprep.subr.mxu0 %v45_v23  ;;  %v74_v38 = vld [vmem:[%s777_s1 + $0x1b0] sm:$0xff]  ;;  %v25_v41 = vld [vmem:[%s777_s1 + $0x28] sm:$0xff]  ;;  %v40_v43 = vld [vmem:[%s777_s1 + $0xa0] sm:$0xff] }
   0xf   :  { %386 = vmatpush3.msra.mxu1 %v62_v24  ;;  %353 = vmatpush3.msra.mxu0 %v29_v25  ;;  %v58_v40 = vld [vmem:[%s777_s1 + $0x130] sm:$0xff]  ;;  %v73_v42 = vld [vmem:[%s777_s1 + $0x1a8] sm:$0xff]  ;;  %v24_v45 = vld [vmem:[%s777_s1 + $0x20] sm:$0xff] }
  0x10   :  { %387 = vmatprep.subr.mxu1 %v77_v26  ;;  %354 = vmatprep.subr.mxu0 %v44_v27  ;;  %v57_v44 = vld [vmem:[%s777_s1 + $0x128] sm:$0xff]  ;;  %v72_v46 = vld [vmem:[%s777_s1 + $0x1a0] sm:$0xff]  ;;  %v39_v47 = vld [vmem:[%s777_s1 + $0x98] sm:$0xff] }
  0x11   :  { %388 = vmatpush3.msra.mxu1 %v61_v28  ;;  %355 = vmatpush3.msra.mxu0 %v28_v29  ;;  %v56_v48 = vld [vmem:[%s777_s1 + $0x120] sm:$0xff]  ;;  %v23_v49 = vld [vmem:[%s777_s1 + $0x18] sm:$0xff]  ;;  %v38_v51 = vld [vmem:[%s777_s1 + $0x90] sm:$0xff] }
  0x12   :  { %389 = vmatprep.subr.mxu1 %v76_v30  ;;  %356 = vmatprep.subr.mxu0 %v43_v31  ;;  %v71_v50 = vld [vmem:[%s777_s1 + $0x198] sm:$0xff]  ;;  %v22_v53 = vld [vmem:[%s777_s1 + $0x10] sm:$0xff]  ;;  %v37_v55 = vld [vmem:[%s777_s1 + $0x88] sm:$0xff] }
  0x13   :  { %390 = vmatpush3.msra.mxu1 %v60_v32  ;;  %357 = vmatpush3.msra.mxu0 %v27_v33  ;;  %v55_v52 = vld [vmem:[%s777_s1 + $0x118] sm:$0xff]  ;;  %v70_v54 = vld [vmem:[%s777_s1 + $0x190] sm:$0xff]  ;;  %v21_v57 = vld [vmem:[%s777_s1 + $0x8] sm:$0xff] }
  0x14   :  { %391 = vmatprep.subr.mxu1 %v75_v34  ;;  %358 = vmatprep.subr.mxu0 %v42_v35  ;;  %v54_v56 = vld [vmem:[%s777_s1 + $0x110] sm:$0xff]  ;;  %v69_v58 = vld [vmem:[%s777_s1 + $0x188] sm:$0xff]  ;;  %v36_v59 = vld [vmem:[%s777_s1 + $0x80] sm:$0xff] }
  0x15   :  { %392 = vmatpush3.msra.mxu1 %v59_v36  ;;  %359 = vmatpush3.msra.mxu0 %v26_v37  ;;  %v15_v60 = vld [vmem:[%s778_s0 + $0x8] sm:$0xff]  ;;  %v20_v61 = vld [vmem:[%s777_s1] sm:$0xff]  ;;  %v115_v1 = vld [vmem:[%s777_s1 + $0x2f8] sm:$0xff] }
  0x16   :  { %393 = vmatprep.subr.mxu1 %v74_v38  ;;  %360 = vmatprep.subr.mxu0 %v41_v39  ;;  %v53_v62 = vld [vmem:[%s777_s1 + $0x108] sm:$0xff]  ;;  %v14_v63 = vld [vmem:[%s778_s0] sm:$0xff]  ;;  %v17_v3 = vld [vmem:[%s778_s0 + $0x18] sm:$0xff] }
  0x17   :  { %394 = vmatpush3.msra.mxu1 %v58_v40  ;;  %361 = vmatpush3.msra.mxu0 %v25_v41  ;;  %v68_v0 = vld [vmem:[%s777_s1 + $0x180] sm:$0xff]  ;;  %v99_v4 = vld [vmem:[%s777_s1 + $0x278] sm:$0xff]  ;;  %v16_v5 = vld [vmem:[%s778_s0 + $0x10] sm:$0xff] }
  0x18   :  { %395 = vmatprep.subr.mxu1 %v73_v42  ;;  %362 = vmatprep.subr.mxu0 %v40_v43  ;;  %v52_v2 = vld [vmem:[%s777_s1 + $0x100] sm:$0xff]  ;;  %v114_v6 = vld [vmem:[%s777_s1 + $0x2f0] sm:$0xff]  ;;  %v19_v8 = vld [vmem:[%s778_s0 + $0x28] sm:$0xff] }
  0x19   :  { %396 = vmatpush3.msra.mxu1 %v57_v44  ;;  %363 = vmatpush3.msra.mxu0 %v24_v45  ;;  %v98_v7 = vld [vmem:[%s777_s1 + $0x270] sm:$0xff]  ;;  %v113_v9 = vld [vmem:[%s777_s1 + $0x2e8] sm:$0xff]  ;;  %v112_v11 = vld [vmem:[%s777_s1 + $0x2e0] sm:$0xff] }
  0x1a   :  { %397 = vmatprep.subr.mxu1 %v72_v46  ;;  %364 = vmatprep.subr.mxu0 %v39_v47  ;;  %v97_v10 = vld [vmem:[%s777_s1 + $0x268] sm:$0xff]  ;;  %v96_v12 = vld [vmem:[%s777_s1 + $0x260] sm:$0xff]  ;;  %v111_v13 = vld [vmem:[%s777_s1 + $0x2d8] sm:$0xff] }
  0x1b   :  { %398 = vmatpush3.msra.mxu1 %v56_v48  ;;  %365 = vmatpush3.msra.mxu0 %v23_v49  ;;  %v95_v14 = vld [vmem:[%s777_s1 + $0x258] sm:$0xff]  ;;  %v110_v15 = vld [vmem:[%s777_s1 + $0x2d0] sm:$0xff]  ;;  %v109_v17 = vld [vmem:[%s777_s1 + $0x2c8] sm:$0xff] }
  0x1c   :  { %399 = vmatprep.subr.mxu1 %v71_v50  ;;  %366 = vmatprep.subr.mxu0 %v38_v51  ;;  %v94_v16 = vld [vmem:[%s777_s1 + $0x250] sm:$0xff]  ;;  %v93_v18 = vld [vmem:[%s777_s1 + $0x248] sm:$0xff]  ;;  %v108_v19 = vld [vmem:[%s777_s1 + $0x2c0] sm:$0xff] }
  0x1d   :  { %400 = vmatpush3.msra.mxu1 %v55_v52  ;;  %367 = vmatpush3.msra.mxu0 %v22_v53  ;;  %v92_v20 = vld [vmem:[%s777_s1 + $0x240] sm:$0xff]  ;;  %v107_v21 = vld [vmem:[%s777_s1 + $0x2b8] sm:$0xff]  ;;  %v106_v23 = vld [vmem:[%s777_s1 + $0x2b0] sm:$0xff] }
  0x1e   :  { %401 = vmatprep.subr.mxu1 %v70_v54  ;;  %368 = vmatprep.subr.mxu0 %v37_v55  ;;  %v91_v22 = vld [vmem:[%s777_s1 + $0x238] sm:$0xff]  ;;  %v90_v24 = vld [vmem:[%s777_s1 + $0x230] sm:$0xff]  ;;  %v105_v25 = vld [vmem:[%s777_s1 + $0x2a8] sm:$0xff] }
  0x1f   :  { %402 = vmatpush3.msra.mxu1 %v54_v56  ;;  %369 = vmatpush3.msra.mxu0 %v21_v57  ;;  %v89_v26 = vld [vmem:[%s777_s1 + $0x228] sm:$0xff]  ;;  %v104_v27 = vld [vmem:[%s777_s1 + $0x2a0] sm:$0xff]  ;;  %v103_v29 = vld [vmem:[%s777_s1 + $0x298] sm:$0xff] }
  0x20   :  { %403 = vmatprep.subr.mxu1 %v69_v58  ;;  %370 = vmatprep.subr.mxu0 %v36_v59  ;;  %v88_v28 = vld [vmem:[%s777_s1 + $0x220] sm:$0xff]  ;;  %v87_v30 = vld [vmem:[%s777_s1 + $0x218] sm:$0xff]  ;;  %v102_v31 = vld [vmem:[%s777_s1 + $0x290] sm:$0xff] }
  0x21   :  { %187 = vmatprep.mubr.f32.mxu0 %v15_v60  ;;  %371 = vmatpush3.msra.mxu0 %v20_v61  ;;  %v86_v32 = vld [vmem:[%s777_s1 + $0x210] sm:$0xff]  ;;  %v101_v33 = vld [vmem:[%s777_s1 + $0x288] sm:$0xff]  ;;  %v100_v35 = vld [vmem:[%s777_s1 + $0x280] sm:$0xff] }
  0x22   :  { %404 = vmatpush3.msra.mxu1 %v53_v62  ;;  %188 = vmatmul.mubr.f32.vlgmr.msra.gmra.mxu0 %v14_v63  ;;  %v85_v34 = vld [vmem:[%s777_s1 + $0x208] sm:$0xff]  ;;  %v84_v36 = vld [vmem:[%s777_s1 + $0x200] sm:$0xff] }
  0x23   :  { %405 = vmatprep.subr.mxu1 %v68_v0  ;;  %410 = vmatprep.subr.mxu0 %v115_v1  ;;  %v18_v37 = vld [vmem:[%s778_s0 + $0x20] sm:$0xff] }
  0x24   :  { %406 = vmatpush3.msra.mxu1 %v52_v2  ;;  %257 = vmatprep.mubr.f32.mxu1 %v17_v3  ;;  %v339_v42 = vld [vmem:[%s779_s2] ss:$0 sm:$0xff] }
  0x25   :  { %411 = vmatpush3.msra.mxu0 %v99_v4  ;;  %258 = vmatmul.mubr.f32.vlgmr.msra.gmra.mxu1 %v16_v5 }
  0x26   :  { %412 = vmatprep.subr.mxu0 %v114_v6  ;;  %327 = vmatprep.mubr.f32.mxu0 %v19_v8 }
  0x27   :  { %413 = vmatpush3.msra.mxu0 %v98_v7 }
  0x28   :  { %414 = vmatprep.subr.mxu0 %v113_v9 }
  0x29   :  { %415 = vmatpush3.msra.mxu0 %v97_v10 }
  0x2a   :  { %416 = vmatprep.subr.mxu0 %v112_v11 }
  0x2b   :  { %417 = vmatpush3.msra.mxu0 %v96_v12 }
  0x2c   :  { %418 = vmatprep.subr.mxu0 %v111_v13 }
  0x2d   :  { %419 = vmatpush3.msra.mxu0 %v95_v14 }
  0x2e   :  { %420 = vmatprep.subr.mxu0 %v110_v15 }
  0x2f   :  { %421 = vmatpush3.msra.mxu0 %v94_v16 }
  0x30   :  { %422 = vmatprep.subr.mxu0 %v109_v17 }
  0x31   :  { %423 = vmatpush3.msra.mxu0 %v93_v18 }
  0x32   :  { %424 = vmatprep.subr.mxu0 %v108_v19 }
  0x33   :  { %425 = vmatpush3.msra.mxu0 %v92_v20 }
  0x34   :  { %426 = vmatprep.subr.mxu0 %v107_v21 }
  0x35   :  { %427 = vmatpush3.msra.mxu0 %v91_v22 }
  0x36   :  { %428 = vmatprep.subr.mxu0 %v106_v23 }
  0x37   :  { %429 = vmatpush3.msra.mxu0 %v90_v24 }
  0x38   :  { %430 = vmatprep.subr.mxu0 %v105_v25 }
  0x39   :  { %431 = vmatpush3.msra.mxu0 %v89_v26 }
  0x3a   :  { %432 = vmatprep.subr.mxu0 %v104_v27 }
  0x3b   :  { %433 = vmatpush3.msra.mxu0 %v88_v28 }
  0x3c   :  { %434 = vmatprep.subr.mxu0 %v103_v29 }
  0x3d   :  { %435 = vmatpush3.msra.mxu0 %v87_v30 }
  0x3e   :  { %436 = vmatprep.subr.mxu0 %v102_v31 }
  0x3f   :  { %437 = vmatpush3.msra.mxu0 %v86_v32 }
  0x40   :  { %438 = vmatprep.subr.mxu0 %v101_v33 }
  0x41   :  { %439 = vmatpush3.msra.mxu0 %v85_v34 }
  0x42   :  { %440 = vmatprep.subr.mxu0 %v100_v35 }
  0x43   :  { %441 = vmatpush3.msra.mxu0 %v84_v36 }
  0x44   :  { %328 = vmatmul.mubr.f32.vlgmr.msra.gmra.mxu0 %v18_v37 }
  0xe2   :  { %v372_v38 = vpop.f32.mrf.mxu0 }
  0xe4   :  { %v373_v39 = vpop.f32.mrf.mxu0 }
  0xe5   :  { %v407_v40 = vpop.f32.mrf.mxu1  ;;  %v374_v41 = vadd.f32 %v373_v39, %v372_v38 }
  0xe7   :  { %v408_v43 = vpop.f32.mrf.mxu1  ;;  %v190_v44 = vadd.f32 %v374_v41, %v339_v42 }
  0xe8   :  { %v409_v45 = vadd.f32 %v408_v43, %v407_v40 }
  0xea   :  { %v260_v48 = vadd.f32 %v409_v45, %v190_v44 }
 0x104   :  { %v442_v46 = vpop.f32.mrf.mxu0 }
 0x106   :  { %v443_v47 = vpop.f32.mrf.mxu0 }
 0x107   :  { %v444_v49 = vadd.f32 %v443_v47, %v442_v46 }
 0x109   :  { %v330_v50 = vadd.f32 %v444_v49, %v260_v48 }
 0x10b   :  { %334 = vst.msk [vmem:[%s780_s3] sm:$0xff] %vm333_vm0, %v330_v50 }

</bundles_post_ra>
